<compile_context>
chip_gen: v6e
topology: v6e:2x2x1
jax: 0.10.0
libtpu: 0.0.40
codegen_flags: <defaults>
</compile_context>

<pallas_src>
import math

import jax
import jax.numpy as jnp
import numpy as np
from jax.experimental import pallas as pl
from jax.experimental.pallas import tpu as pltpu


def _round_up(x: int, m: int) -> int:
    return ((x + m - 1) // m) * m


def _transform_kernel(p_ref, out_ref):
    # p_ref:   (5, TILE_B) rows = [sx, sy, theta, tx, ty], lane-dense over B.
    # out_ref: (6, TILE_B) rows = [m00, m01, m02, m10, m11, m12].
    sx = p_ref[0:1, :]
    sy = p_ref[1:2, :]
    th = p_ref[2:3, :]
    tx = p_ref[3:4, :]
    ty = p_ref[4:5, :]

    c = jnp.cos(th)  # EUP
    s = jnp.sin(th)  # EUP

    # Row-sliced stores: each (1, TILE_B) product streams straight to VMEM.
    out_ref[0:1, :] = c * sx
    out_ref[1:2, :] = -(s * sy)
    out_ref[2:3, :] = tx
    out_ref[3:4, :] = s * sx
    out_ref[4:5, :] = c * sy
    out_ref[5:6, :] = ty


def _transformation_rows(params):
    """Lane-dense core: params (5, B) -> (6, B) top-two affine rows.

    Consumers that can work with the SoA layout should call this directly and
    skip the (B, 3, 3) transpose entirely.
    """
    _, B = params.shape

    # ---- tiling: bound pad waste to <=128 lanes per step, large tiles -------
    b_pad = _round_up(max(B, 1), 128)
    tile_cap = 65536                 # 64K lanes: ~8 MiB double-buffered VMEM
    n_steps = pl.cdiv(b_pad, tile_cap)
    if b_pad >= 16384:               # v7x: keep >=2 steps so both TCs get work
        n_steps = max(n_steps, 2)
    tile_b = _round_up(math.ceil(b_pad / n_steps), 128)
    b_total = n_steps * tile_b

    params = params.astype(jnp.float32)
    if b_total != B:
        params = jnp.pad(params, ((0, 0), (0, b_total - B)))

    out6 = pl.pallas_call(
        _transform_kernel,
        out_shape=jax.ShapeDtypeStruct((6, b_total), jnp.float32),
        grid=(n_steps,),
        in_specs=[pl.BlockSpec((5, tile_b), lambda i: (0, i))],
        out_specs=pl.BlockSpec((6, tile_b), lambda i: (0, i)),
        compiler_params=pltpu.CompilerParams(
            dimension_semantics=("parallel",),
        ),
    )(params)

    return out6[:, :B]


def transformation_matrix(scale, rotation, translation):
    """JAX/Pallas equivalent of TransformationMatrix.forward -> (B, 3, 3)."""
    B = scale.shape[0]

    # One fused (5, B) lane-dense input slab -> a single DMA stream per step.
    params = jnp.stack(
        [scale[:, 0], scale[:, 1], rotation,
         translation[:, 0], translation[:, 1]],
        axis=0,
    )

    rows = _transformation_rows(params)                       # (6, B)

    # Layout plumbing only: (6, B) -> (B, 2, 3), append constant [0, 0, 1].
    affine = rows.T.reshape(B, 2, 3)
    bottom = jnp.broadcast_to(
        jnp.array([0.0, 0.0, 1.0], dtype=jnp.float32), (B, 1, 3))
    return jnp.concatenate([affine, bottom], axis=1)


def _reference(scale, rotation, translation):
    """Pure-JAX reference matching the PyTorch module exactly."""
    B = scale.shape[0]
    eye = jnp.eye(3, dtype=jnp.float32)
    S = jnp.tile(eye, (B, 1, 1))
    R = jnp.tile(eye, (B, 1, 1))
    T = jnp.tile(eye, (B, 1, 1))
    S = S.at[:, 0, 0].set(scale[:, 0]).at[:, 1, 1].set(scale[:, 1])
    R = (R.at[:, 0, 0].set(jnp.cos(rotation))
          .at[:, 0, 1].set(-jnp.sin(rotation))
          .at[:, 1, 0].set(jnp.sin(rotation))
          .at[:, 1, 1].set(jnp.cos(rotation)))
    T = T.at[:, 0, 2].set(translation[:, 0]).at[:, 1, 2].set(translation[:, 1])
    return jnp.einsum("bik,bkj->bij", T, jnp.einsum("bik,bkj->bij", R, S))


if __name__ == "__main__":
    key = jax.random.PRNGKey(0)
    k1, k2, k3 = jax.random.split(key, 3)
    B = 8
    scale = jax.random.uniform(k1, (B, 2), jnp.float32, 0.5, 1.5)
    rotation = jax.random.uniform(k2, (B,), jnp.float32, -np.pi, np.pi)
    translation = jax.random.normal(k3, (B, 2), jnp.float32)

    out = transformation_matrix(scale, rotation, translation)
    out = jax.block_until_ready(out)

    ref = _reference(scale, rotation, translation)
    np.testing.assert_allclose(np.asarray(out), np.asarray(ref),
                               rtol=1e-5, atol=1e-5)
    assert out.shape == (B, 3, 3) and out.dtype == jnp.float32
    print("KERNEL_OK")
</pallas_src>

<mosaic_0001>
module attributes {stable_mosaic.version = 11 : i64} {
  func.func @_transform_kernel(%arg0: i32, %arg1: memref<5x128xf32, #tpu.memory_space<vmem>>, %arg2: memref<6x128xf32, #tpu.memory_space<vmem>>) attributes {dimension_semantics = [#tpu.dimension_semantics<parallel>], iteration_bounds = array<i64: 1>, scalar_prefetch = 0 : i64, scratch_operands = 0 : i64, tpu.core_type = #tpu.core_type<tc>, window_params = [{transform_indices = @transform_0, window_bounds = array<i64: 5, 128>}, {transform_indices = @transform_1, window_bounds = array<i64: 6, 128>}]} {
    %c0 = arith.constant 0 : index
    %c0_0 = arith.constant 0 : index
    %0 = vector.load %arg1[%c0, %c0_0] : memref<5x128xf32, #tpu.memory_space<vmem>>, vector<1x128xf32>
    %c1 = arith.constant 1 : index
    %c0_1 = arith.constant 0 : index
    %1 = vector.load %arg1[%c1, %c0_1] : memref<5x128xf32, #tpu.memory_space<vmem>>, vector<1x128xf32>
    %c2 = arith.constant 2 : index
    %c0_2 = arith.constant 0 : index
    %2 = vector.load %arg1[%c2, %c0_2] : memref<5x128xf32, #tpu.memory_space<vmem>>, vector<1x128xf32>
    %c3 = arith.constant 3 : index
    %c0_3 = arith.constant 0 : index
    %3 = vector.load %arg1[%c3, %c0_3] : memref<5x128xf32, #tpu.memory_space<vmem>>, vector<1x128xf32>
    %c4 = arith.constant 4 : index
    %c0_4 = arith.constant 0 : index
    %4 = vector.load %arg1[%c4, %c0_4] : memref<5x128xf32, #tpu.memory_space<vmem>>, vector<1x128xf32>
    %5 = math.cos %2 : vector<1x128xf32>
    %6 = math.sin %2 : vector<1x128xf32>
    %7 = arith.mulf %5, %0 : vector<1x128xf32>
    %c0_5 = arith.constant 0 : index
    %c0_6 = arith.constant 0 : index
    %8 = vector.load %arg2[%c0_5, %c0_6] : memref<6x128xf32, #tpu.memory_space<vmem>>, vector<1x128xf32>
    tpu.vector_store %arg2[%c0_5, %c0_6], %7 {strides = array<i32>} : memref<6x128xf32, #tpu.memory_space<vmem>>, vector<1x128xf32>,
    %9 = arith.mulf %6, %1 : vector<1x128xf32>
    %cst = arith.constant 0.000000e+00 : f32
    %10 = vector.broadcast %cst : f32 to vector<1x128xf32>
    %11 = arith.subf %10, %9 : vector<1x128xf32>
    %c1_7 = arith.constant 1 : index
    %c0_8 = arith.constant 0 : index
    %12 = vector.load %arg2[%c1_7, %c0_8] : memref<6x128xf32, #tpu.memory_space<vmem>>, vector<1x128xf32>
    tpu.vector_store %arg2[%c1_7, %c0_8], %11 {strides = array<i32>} : memref<6x128xf32, #tpu.memory_space<vmem>>, vector<1x128xf32>,
    %c2_9 = arith.constant 2 : index
    %c0_10 = arith.constant 0 : index
    %13 = vector.load %arg2[%c2_9, %c0_10] : memref<6x128xf32, #tpu.memory_space<vmem>>, vector<1x128xf32>
    tpu.vector_store %arg2[%c2_9, %c0_10], %3 {strides = array<i32>} : memref<6x128xf32, #tpu.memory_space<vmem>>, vector<1x128xf32>,
    %14 = arith.mulf %6, %0 : vector<1x128xf32>
    %c3_11 = arith.constant 3 : index
    %c0_12 = arith.constant 0 : index
    %15 = vector.load %arg2[%c3_11, %c0_12] : memref<6x128xf32, #tpu.memory_space<vmem>>, vector<1x128xf32>
    tpu.vector_store %arg2[%c3_11, %c0_12], %14 {strides = array<i32>} : memref<6x128xf32, #tpu.memory_space<vmem>>, vector<1x128xf32>,
    %16 = arith.mulf %5, %1 : vector<1x128xf32>
    %c4_13 = arith.constant 4 : index
    %c0_14 = arith.constant 0 : index
    %17 = vector.load %arg2[%c4_13, %c0_14] : memref<6x128xf32, #tpu.memory_space<vmem>>, vector<1x128xf32>
    tpu.vector_store %arg2[%c4_13, %c0_14], %16 {strides = array<i32>} : memref<6x128xf32, #tpu.memory_space<vmem>>, vector<1x128xf32>,
    %c5 = arith.constant 5 : index
    %c0_15 = arith.constant 0 : index
    %18 = vector.load %arg2[%c5, %c0_15] : memref<6x128xf32, #tpu.memory_space<vmem>>, vector<1x128xf32>
    tpu.vector_store %arg2[%c5, %c0_15], %4 {strides = array<i32>} : memref<6x128xf32, #tpu.memory_space<vmem>>, vector<1x128xf32>,
    return
  }
  func.func @transform_0(%arg0: i32) -> (i32, i32) {
    %c0_i32 = arith.constant 0 : i32
    %c0_i32_0 = arith.constant 0 : i32
    return %c0_i32, %arg0 : i32, i32
  }
  func.func @transform_1(%arg0: i32) -> (i32, i32) {
    %c0_i32 = arith.constant 0 : i32
    %c0_i32_0 = arith.constant 0 : i32
    return %c0_i32, %arg0 : i32, i32
  }
}

</mosaic_0001>

<bundles_post_ra>
// kernel: tpu_custom_call.1
= control target key start
LH: loop header
LB: loop body
LE: loop exit
PB: predicated region body
PF: predicated region fallthrough
CT: control target
= control target key end

     0   :  { %6 = vsyncpa [#allocation3], 0  ;;  %s372_s0 = inlined_call_operand.hbm [shape: f32[5,128], index: 0, kind: input, shape index: {}]   ;;  %s373_s1 = inlined_call_operand.hbm [shape: f32[6,128], index: 1, kind: output, shape index: {}]  }
   0x1   :  { %7 = vsyncpa [#allocation4], 0  ;;  %s327_s6 = smov [#allocation2]  }
   0x2   :  { %s14_s7 = sshll.u32 %s327_s6, 4  ;;  %s15_s7 = int_to_ptr.vmem [resolvable:$true] %s14_s7 }
   0x3   :  { %s291_s8 = scalar_lea.vmem %s15_s7, 128  ;;  %p296_p1 = scmp.lt.s32.totalorder %s15_s7, %s15_s7 }
   0x4   :  { %p292_p0 = scmp.ne.s32.totalorder %s15_s7, %s291_s8  ;;  %p297_p2 = scmp.lt.s32.totalorder %s291_s8, %s291_s8 }
   0x6   :  { %p298_p3 = por %p297_p2, %p296_p1 }
   0x8   :  { %p299_p4 = pnand %p298_p3, %p292_p0 }
   0xa   :  { %302 = shalt.err (!%p299_p4)
}
   0xb   :  { %17 = dma.hbm_to_vmem [thread:$0]  %s372_s0, 128, %s15_s7, [#allocation3]  }
   0xc   :  { %323 = dma.done.wait [#allocation3], 128  }
   0xd   :  { %324 = vsyncadd [#allocation3], 4294967168  ;;  %v348_v0 = vld [vmem:[#allocation2 + $0x2] sm:$0x1]  ;;  %v24_v2 = vld [vmem:[#allocation2 + $0x3] sm:$0x1] }
   0xe   :  { %v29_v1 = vand.u32 2139095040, %v348_v0  ;;  %238 = vst [vmem:[#allocation5 + $0x2] sm:$0x1] %v24_v2  ;;  %v25_v3 = vld [vmem:[#allocation2 + $0x4] sm:$0x1]  ;;  %vm28_vm7 = vcmp.lt.s32.totalorder %v348_v0, 0  ;;  %vm118_vm15 = vweird.f32 %v348_v0 }
   0xf   :  { %243 = vst [vmem:[#allocation5 + $0x5] sm:$0x1] %v25_v3  ;;  %v26_v5 = vand.u32 2147483647, %v348_v0  ;;  %v328_v14 = vmov 683565275  }
  0x10   :  { %v30_v4 = vshrl.u32 %v29_v1, 23  ;;  %v329_v16 = vmov 2475754826   ;;  %v330_v18 = vmov 2131351028   ;;  %s334_s0 = smov [#allocation5]  }
  0x11   :  { %v33_v8 = vand.u32 8388607, %v26_v5  ;;  %v331_v20 = vmov 2102212464   ;;  %v332_v22 = vmov 920167782  }
  0x12   :  { %v259_v6 = vadd.s32 4294967169, %v30_v4  ;;  %v333_v29 = vmov 1326507024   ;;  %vm27_vm8 = vcmp.le.f32.partialorder %v26_v5, 0.7853982  ;;  %s250_s11 = sshll.u32 %s334_s0, 4  ;;  %s251_s11 = int_to_ptr.vmem [resolvable:$true] %s250_s11 }
  0x13   :  { %v34_v11 = vor.u32 8388608, %v33_v8  ;;  %s303_s12 = scalar_lea.vmem %s251_s11, 128  ;;  %p308_p6 = scmp.lt.s32.totalorder %s251_s11, %s251_s11 }
  0x14   :  { %v36_v7 = vadd.s32 1, %v259_v6  ;;  %p304_p5 = scmp.ne.s32.totalorder %s251_s11, %s303_s12  ;;  %p309_p7 = scmp.lt.s32.totalorder %s303_s12, %s303_s12 }
  0x15   :  { %v74_v31 = vshll.u32 %v34_v11, 8 }
  0x16   :  { %vm37_vm0 = vcmp.gt.s32.totalorder %v36_v7, 0  ;;  %p310_p8 = por %p309_p7, %p308_p6 }
  0x17   :  { %v38_v9 = vsel %vm37_vm0, %v36_v7, 0 }
  0x18   :  { %v40_v10 = vand.u32 31, %v38_v9  ;;  %v39_v12 = vshrl.u32 %v38_v9, 5  ;;  %p311_p9 = pnand %p310_p8, %p304_p5 }
  0x1a   :  { %v41_v13 = vsub.s32 32, %v40_v10  ;;  %v43_v15 = vshll.u32 %v328_v14, %v40_v10  ;;  %v46_v17 = vshll.u32 %v329_v16, %v40_v10  ;;  %v49_v19 = vshll.u32 %v330_v18, %v40_v10 }
  0x1b   :  { %v52_v21 = vshll.u32 %v331_v20, %v40_v10  ;;  %v55_v23 = vshll.u32 %v332_v22, %v40_v10  ;;  %vm58_vm1 = vcmp.lt.s32.totalorder %v39_v12, 1  ;;  %vm61_vm2 = vcmp.lt.s32.totalorder %v39_v12, 4 }
  0x1c   :  { %v42_v24 = vshrl.u32 %v328_v14, %v41_v13  ;;  %v44_v25 = vshrl.u32 %v329_v16, %v41_v13  ;;  %v47_v26 = vshrl.u32 %v330_v18, %v41_v13  ;;  %v50_v27 = vshrl.u32 %v331_v20, %v41_v13 }
  0x1d   :  { %v53_v28 = vshrl.u32 %v332_v22, %v41_v13  ;;  %v56_v30 = vshrl.u32 %v333_v29, %v41_v13  ;;  %vm59_vm3 = vcmp.lt.s32.totalorder %v39_v12, 2  ;;  %vm60_vm4 = vcmp.lt.s32.totalorder %v39_v12, 3 }
  0x1e   :  { %v45_v32 = vor.u32 %v44_v25, %v43_v15  ;;  %v48_v33 = vor.u32 %v47_v26, %v46_v17  ;;  %v51_v34 = vor.u32 %v50_v27, %v49_v19 }
  0x1f   :  { %v54_v35 = vor.u32 %v53_v28, %v52_v21  ;;  %v57_v36 = vor.u32 %v56_v30, %v55_v23  ;;  %v21_v30 = vld [vmem:[#allocation2] sm:$0x1] }
  0x20   :  { %v62_v37 = vsel %vm58_vm1, %v42_v24, %v45_v32  ;;  %v63_v38 = vsel %vm61_vm2, %v51_v34, 2102212464  ;;  %v66_v39 = vsel %vm58_vm1, %v45_v32, %v48_v33  ;;  %v70_v40 = vsel %vm58_vm1, %v48_v33, %v51_v34  ;;  %v22_v32 = vld [vmem:[#allocation2 + $0x1] sm:$0x1] }
  0x21   :  { %v64_v41 = vsel %vm60_vm4, %v48_v33, %v63_v38  ;;  %v67_v42 = vsel %vm61_vm2, %v54_v35, 920167782  ;;  %v71_v43 = vsel %vm61_vm2, %v57_v36, 1326507024 }
  0x22   :  { %v68_v44 = vsel %vm60_vm4, %v51_v34, %v67_v42  ;;  %v72_v45 = vsel %vm60_vm4, %v54_v35, %v71_v43  ;;  %v65_v46 = vsel %vm59_vm3, %v62_v37, %v64_v41 }
  0x23   :  { %v69_v47 = vsel %vm59_vm3, %v66_v39, %v68_v44  ;;  %v73_v48 = vsel %vm59_vm3, %v70_v40, %v72_v45  ;;  %v81_v53 = vmul.u32 %v74_v31, %v65_v46 }
  0x24   :  { %v354_v49 = vmul.u32.u64.low %v74_v31, %v73_v48  ;;  %v355_v50 = vmul.u32.u64.high %v74_v31, %v73_v48, %v354_v49  ;;  %v357_v51 = vmul.u32.u64.low %v74_v31, %v69_v47  ;;  %v358_v52 = vmul.u32.u64.high %v74_v31, %v69_v47, %v357_v51 }
  0x26   :  { %vm83_vm5 = vc.u32 %v355_v50, %v357_v51  ;;  %v84_v54 = vadd.s32 1, %v358_v52  ;;  %v82_v2 = vadd.s32 %v357_v51, %v355_v50 }
  0x28   :  { %v85_v55 = vsel %vm83_vm5, %v84_v54, %v358_v52 }
  0x29   :  { %v86_v56 = vadd.s32 %v85_v55, %v81_v53 }
  0x2b   :  { %v87_v57 = vadd.s32 536870912, %v86_v56 }
  0x2d   :  { %v88_v58 = vshrl.u32 %v87_v57, 30 }
  0x2f   :  { %v89_v59 = vshll.u32 %v88_v58, 30  ;;  %v112_v16 = vsub.s32 4, %v88_v58 }
  0x31   :  { %v90_v60 = vsub.s32 %v86_v56, %v89_v59  ;;  %v113_v19 = vsel %vm28_vm7, %v112_v16, %v88_v58 }
  0x32   :  { %v115_v21 = vsel %vm27_vm8, 0, %v113_v19 }
  0x33   :  { %v92_v61 = vsub.s32 0, %v90_v60  ;;  %v222_v22 = vadd.s32 3, %v115_v21  ;;  %v119_v23 = vand.u32 3, %v115_v21 }
  0x35   :  { %v260_v62 = vmin.u32 %v92_v61, %v90_v60  ;;  %v223_v24 = vand.u32 3, %v222_v22  ;;  %vm124_vm9 = vcmp.eq.s32.totalorder %v119_v23, 2  ;;  %vm121_vm11 = vcmp.eq.s32.totalorder %v119_v23, 0 }
  0x36   :  { %vm120_vm13 = vcmp.lt.s32.totalorder %v119_v23, 2 }
  0x37   :  { %v94_v63 = vclz %v260_v62  ;;  %vm228_vm10 = vcmp.eq.s32.totalorder %v223_v24, 2  ;;  %vm225_vm12 = vcmp.eq.s32.totalorder %v223_v24, 0  ;;  %vm224_vm14 = vcmp.lt.s32.totalorder %v223_v24, 2 }
  0x39   :  { %v261_v1 = vadd.s32 4294967294, %v94_v63 }
  0x3b   :  { %vm262_vm6 = vcmp.lt.s32.totalorder %v261_v1, 0 }
  0x3c   :  { %v97_v3 = vsel %vm262_vm6, 0, %v261_v1 }
  0x3d   :  { %v98_v4 = vsub.s32 32, %v97_v3  ;;  %v99_v6 = vshll.u32 %v90_v60, %v97_v3  ;;  %v102_v7 = vsub.s32 4294967266, %v97_v3 }
  0x3f   :  { %v100_v8 = vshrl.u32 %v82_v2, %v98_v4  ;;  %v103_v9 = vadd.s32 127, %v102_v7 }
  0x41   :  { %v101_v10 = vor.u32 %v100_v8, %v99_v6  ;;  %v104_v11 = vshll.u32 %v103_v9, 23 }
  0x43   :  { %v105_v12 = vor.u32 4788187, %v104_v11  ;;  %v108_v13 = vcvt.s32.f32 %v101_v10 }
  0x45   :  { %v106_v14 = vand.u32 2147483647, %v105_v12 }
  0x47   :  { %v109_v15 = vmul.f32 %v108_v13, %v106_v14 }
  0x49   :  { %v110_v17 = vxor.u32 2147483648, %v109_v15 }
  0x4b   :  { %v111_v18 = vsel %vm28_vm7, %v110_v17, %v109_v15 }
  0x4c   :  { %v114_v20 = vsel %vm27_vm8, %v348_v0, %v111_v18 }
  0x4d   :  { %279 = vcosq.f32 %v114_v20 }
  0x4e   :  { %281 = vsinq.f32 %v114_v20 }
  0x5a   :  { %v280_v25 = vpop.eup %279 }
  0x5b   :  { %v282_v26 = vpop.eup %281  ;;  %v125_v27 = vxor.u32 2147483648, %v280_v25 }
  0x5c   :  { %v122_v5 = vxor.u32 2147483648, %v282_v26 }
  0x5d   :  { %v126_v28 = vsel %vm124_vm9, %v125_v27, %v282_v26  ;;  %v230_v29 = vsel %vm228_vm10, %v125_v27, %v282_v26 }
  0x5e   :  { %v123_v31 = vsel %vm121_vm11, %v280_v25, %v122_v5  ;;  %v227_v33 = vsel %vm225_vm12, %v280_v25, %v122_v5 }
  0x5f   :  { %v127_v34 = vsel %vm120_vm13, %v123_v31, %v126_v28  ;;  %v231_v35 = vsel %vm224_vm14, %v227_v33, %v230_v29 }
  0x60   :  { %v128_v36 = vsel %vm118_vm15, nan, %v127_v34  ;;  %v232_v37 = vsel %vm118_vm15, nan, %v231_v35 }
  0x61   :  { %v233_v38 = vmul.f32 %v128_v36, %v21_v30  ;;  %v235_v39 = vmul.f32 %v232_v37, %v22_v32  ;;  %v239_v40 = vmul.f32 %v232_v37, %v21_v30  ;;  %v241_v41 = vmul.f32 %v128_v36, %v22_v32 }
  0x63   :  { %234 = vst [vmem:[#allocation5] sm:$0x1] %v233_v38  ;;  %v236_v42 = vsub.f32 0.0, %v235_v39  ;;  %240 = vst [vmem:[#allocation5 + $0x3] sm:$0x1] %v239_v40 }
  0x64   :  { %242 = vst [vmem:[#allocation5 + $0x4] sm:$0x1] %v241_v41 }
  0x65   :  { %237 = vst [vmem:[#allocation5 + $0x1] sm:$0x1] %v236_v42 }
  0x66   :  { %314 = shalt.err (!%p311_p9)
}
  0x67   :  { %253 = dma.vmem_to_hbm [thread:$0]  %s251_s11, 128, %s373_s1, [#allocation4]  }
  0x68   :  { %325 = dma.done.wait [#allocation4], 128  }
  0x69   :  { %326 = vsyncadd [#allocation4], 4294967168 }
  0x6a   :  { %257 = vsyncpa [#allocation3], 1 }
  0x6b   :  { %258 = vsyncpa [#allocation4], 1 }

</bundles_post_ra>
